<compile_context>
chip_gen: v5e
topology: v5e:2x2
jax: 0.10.0
libtpu: 0.0.40
codegen_flags: <defaults>
</compile_context>

<pallas_src>
import jax
import jax.numpy as jnp
from jax.experimental import pallas as pl
from jax.experimental.pallas import tpu as pltpu


def _round_up(x, m):
    return (x + m - 1) // m * m


def _matmul_bn_relu_kernel(x_ref, w_ref, scale_ref, shift_ref, o_ref):
    # x_ref:     (TM, KC)   im2col rows (rows = flattened batch*length)
    # w_ref:     (KC, TN)   flattened conv weight tile (lane-dense, 128-padded)
    # scale_ref: (1, TN)    folded BN scale
    # shift_ref: (1, TN)    folded (conv bias + BN) shift
    # o_ref:     (TM, TN)   lane-dense output tile
    acc = jnp.dot(x_ref[...], w_ref[...], preferred_element_type=jnp.float32)
    y = acc * scale_ref[...] + shift_ref[...]
    o_ref[...] = jnp.maximum(y, 0.0).astype(o_ref.dtype)


def conv1d_relu(x_ncl, weight, bias, gamma, beta, running_mean, running_var,
                *, padding, eps=1e-5):
    """x_ncl: (N, C_in, L) f32; weight: (C_out, C_in, K). Returns (N, C_out, L_out)."""
    N, C_in, L = x_ncl.shape
    C_out, _, K = weight.shape
    L_out = L + 2 * padding - K + 1
    KC = K * C_in

    # ---- glue (plain JAX): layout, zero-pad, im2col, BN fold ----
    x_nlc = jnp.transpose(x_ncl, (0, 2, 1)).astype(jnp.float32)         # (N, L, C_in)
    x_pad = jnp.pad(x_nlc, ((0, 0), (padding, padding), (0, 0)))        # (N, Lp, C_in)
    # im2col: cols[n, l, k, c] = x_pad[n, l + k, c]  ->  (N*L_out, K*C_in)
    cols = jnp.stack([x_pad[:, k:k + L_out, :] for k in range(K)], axis=2)
    x2d = cols.reshape(N * L_out, KC)

    # weight (C_out, C_in, K) -> (K, C_in, C_out) -> (KC, C_out); matches the
    # (k outer, c_in inner) ordering of the im2col columns.
    w2d = jnp.transpose(weight, (2, 1, 0)).reshape(KC, C_out).astype(jnp.float32)

    scale = (gamma / jnp.sqrt(running_var + eps)).astype(jnp.float32)   # (C_out,)
    shift = ((bias - running_mean) * scale + beta).astype(jnp.float32)  # (C_out,)

    # ---- padding for lane-dense output tiles and 8-aligned row tiles ----
    M = N * L_out
    TN = 128                                    # lane-dense output tile width
    C_out_p = _round_up(C_out, TN)
    TM = 256 if M >= 256 else _round_up(M, 8)   # row tile (sublane-aligned)
    M_p = _round_up(M, TM)

    x2d_p = jnp.pad(x2d, ((0, M_p - M), (0, 0)))
    w2d_p = jnp.pad(w2d, ((0, 0), (0, C_out_p - C_out)))
    scale_p = jnp.pad(scale, (0, C_out_p - C_out)).reshape(1, C_out_p)
    shift_p = jnp.pad(shift, (0, C_out_p - C_out)).reshape(1, C_out_p)

    grid = (M_p // TM, C_out_p // TN)

    out2d = pl.pallas_call(
        _matmul_bn_relu_kernel,
        out_shape=jax.ShapeDtypeStruct((M_p, C_out_p), jnp.float32),
        grid_spec=pltpu.PrefetchScalarGridSpec(
            num_scalar_prefetch=0,
            grid=grid,
            in_specs=[
                pl.BlockSpec((TM, KC), lambda i, j: (i, 0)),
                pl.BlockSpec((KC, TN), lambda i, j: (0, j)),
                pl.BlockSpec((1, TN), lambda i, j: (0, j)),
                pl.BlockSpec((1, TN), lambda i, j: (0, j)),
            ],
            out_specs=pl.BlockSpec((TM, TN), lambda i, j: (i, j)),
        ),
        compiler_params=pltpu.CompilerParams(
            dimension_semantics=("parallel", "parallel"),
            # Double-buffered tiles: 2*TM*KC + 2*KC*TN + 2*TM*TN f32 — well
            # under 32 MiB for the channel counts this module uses; this
            # budget is valid on v5e (128 MiB), v6e (128 MiB) and v7x (64 MiB).
            vmem_limit_bytes=32 * 1024 * 1024,
        ),
    )(x2d_p, w2d_p, scale_p, shift_p)

    # Strip row/channel padding and return PyTorch-style NCL layout.
    out_nlc = out2d[:M, :C_out].reshape(N, L_out, C_out)
    return jnp.transpose(out_nlc, (0, 2, 1))                            # (N, C_out, L_out)


def _reference(x_ncl, weight, bias, gamma, beta, mean, var, *, padding, eps=1e-5):
    # Pure-JAX reference (eval-mode BatchNorm) for validation.
    conv = jax.lax.conv_general_dilated(
        x_ncl, weight, window_strides=(1,), padding=[(padding, padding)],
        dimension_numbers=("NCH", "OIH", "NCH"))
    conv = conv + bias[None, :, None]
    y = (conv - mean[None, :, None]) / jnp.sqrt(var[None, :, None] + eps)
    y = y * gamma[None, :, None] + beta[None, :, None]
    return jnp.maximum(y, 0.0)


if __name__ == "__main__":
    # Small shapes consistent with Conv1dReLU; exercise the three documented
    # (kernel_size, padding) configs: (3,1), (5,2), (7,3).
    N, C_in, C_out, L = 2, 4, 8, 16

    key = jax.random.PRNGKey(0)
    for K, PAD in ((3, 1), (5, 2), (7, 3)):
        key, kx, kw, kb, kg, kbe, km, kv = jax.random.split(key, 8)

        x = jax.random.normal(kx, (N, C_in, L), dtype=jnp.float32)
        weight = jax.random.normal(kw, (C_out, C_in, K), dtype=jnp.float32) * 0.1
        bias = jax.random.normal(kb, (C_out,), dtype=jnp.float32) * 0.1
        gamma = 1.0 + 0.1 * jax.random.normal(kg, (C_out,), dtype=jnp.float32)
        beta = 0.1 * jax.random.normal(kbe, (C_out,), dtype=jnp.float32)
        running_mean = 0.1 * jax.random.normal(km, (C_out,), dtype=jnp.float32)
        running_var = 1.0 + 0.1 * jax.random.uniform(kv, (C_out,), dtype=jnp.float32)

        out = conv1d_relu(x, weight, bias, gamma, beta, running_mean,
                          running_var, padding=PAD)
        out = jax.block_until_ready(out)

        ref = _reference(x, weight, bias, gamma, beta, running_mean,
                         running_var, padding=PAD)
        L_out = L + 2 * PAD - K + 1
        assert out.shape == (N, C_out, L_out), out.shape
        assert jnp.allclose(out, ref, atol=2e-5, rtol=2e-5), \
            f"mismatch vs reference for K={K}, padding={PAD}"

    print("KERNEL_OK")
</pallas_src>

<mosaic_0001>
module attributes {stable_mosaic.version = 11 : i64} {
  func.func @_matmul_bn_relu_kernel(%arg0: i32, %arg1: i32, %arg2: memref<32x12xf32, #tpu.memory_space<vmem>>, %arg3: memref<12x128xf32, #tpu.memory_space<vmem>>, %arg4: memref<1x128xf32, #tpu.memory_space<vmem>>, %arg5: memref<1x128xf32, #tpu.memory_space<vmem>>, %arg6: memref<32x128xf32, #tpu.memory_space<vmem>>) attributes {dimension_semantics = [#tpu.dimension_semantics<parallel>, #tpu.dimension_semantics<parallel>], iteration_bounds = array<i64: 1, 1>, scalar_prefetch = 0 : i64, scratch_operands = 0 : i64, tpu.core_type = #tpu.core_type<tc>, window_params = [{transform_indices = @transform_0, window_bounds = array<i64: 32, 12>}, {transform_indices = @transform_1, window_bounds = array<i64: 12, 128>}, {transform_indices = @transform_2, window_bounds = array<i64: 1, 128>}, {transform_indices = @transform_3, window_bounds = array<i64: 1, 128>}, {transform_indices = @transform_4, window_bounds = array<i64: 32, 128>}]} {
    %c0 = arith.constant 0 : index
    %c0_0 = arith.constant 0 : index
    %0 = vector.load %arg2[%c0, %c0_0] : memref<32x12xf32, #tpu.memory_space<vmem>>, vector<32x12xf32>
    %c0_1 = arith.constant 0 : index
    %c0_2 = arith.constant 0 : index
    %1 = vector.load %arg3[%c0_1, %c0_2] : memref<12x128xf32, #tpu.memory_space<vmem>>, vector<12x128xf32>
    %cst = arith.constant dense<0.000000e+00> : vector<32x128xf32>
    %2 = tpu.matmul %0, %1, %cst {dimension_numbers = #tpu.dot_dimension_numbers<[1], [0], [0], [1], [0, 0, 1, 1], [], []>} : vector<32x12xf32>, vector<12x128xf32>, vector<32x128xf32> -> vector<32x128xf32>
    %c0_3 = arith.constant 0 : index
    %c0_4 = arith.constant 0 : index
    %3 = vector.load %arg4[%c0_3, %c0_4] : memref<1x128xf32, #tpu.memory_space<vmem>>, vector<1x128xf32>
    %4 = vector.broadcast %3 : vector<1x128xf32> to vector<32x128xf32>
    %5 = arith.mulf %2, %4 : vector<32x128xf32>
    %c0_5 = arith.constant 0 : index
    %c0_6 = arith.constant 0 : index
    %6 = vector.load %arg5[%c0_5, %c0_6] : memref<1x128xf32, #tpu.memory_space<vmem>>, vector<1x128xf32>
    %7 = vector.broadcast %6 : vector<1x128xf32> to vector<32x128xf32>
    %8 = arith.addf %5, %7 : vector<32x128xf32>
    %cst_7 = arith.constant 0.000000e+00 : f32
    %9 = vector.broadcast %cst_7 : f32 to vector<32x128xf32>
    %10 = arith.maximumf %8, %9 : vector<32x128xf32>
    %c0_8 = arith.constant 0 : index
    %c0_9 = arith.constant 0 : index
    %11 = vector.load %arg6[%c0_8, %c0_9] : memref<32x128xf32, #tpu.memory_space<vmem>>, vector<32x128xf32>
    tpu.vector_store %arg6[%c0_8, %c0_9], %10 {strides = array<i32>} : memref<32x128xf32, #tpu.memory_space<vmem>>, vector<32x128xf32>,
    return
  }
  func.func @transform_0(%arg0: i32, %arg1: i32) -> (i32, i32) {
    %c0_i32 = arith.constant 0 : i32
    %c0_i32_0 = arith.constant 0 : i32
    return %arg0, %c0_i32 : i32, i32
  }
  func.func @transform_1(%arg0: i32, %arg1: i32) -> (i32, i32) {
    %c0_i32 = arith.constant 0 : i32
    %c0_i32_0 = arith.constant 0 : i32
    return %c0_i32, %arg1 : i32, i32
  }
  func.func @transform_2(%arg0: i32, %arg1: i32) -> (i32, i32) {
    %c0_i32 = arith.constant 0 : i32
    %c0_i32_0 = arith.constant 0 : i32
    return %c0_i32, %arg1 : i32, i32
  }
  func.func @transform_3(%arg0: i32, %arg1: i32) -> (i32, i32) {
    %c0_i32 = arith.constant 0 : i32
    %c0_i32_0 = arith.constant 0 : i32
    return %c0_i32, %arg1 : i32, i32
  }
  func.func @transform_4(%arg0: i32, %arg1: i32) -> (i32, i32) {
    %c0_i32 = arith.constant 0 : i32
    return %arg0, %arg1 : i32, i32
  }
}

</mosaic_0001>

<bundles_post_ra>
// kernel: tpu_custom_call.1
= control target key start
LH: loop header
LB: loop body
LE: loop exit
PB: predicated region body
PF: predicated region fallthrough
CT: control target
= control target key end

     0   :  { %vm37_vm0 = vcmask 1043456   ;;  %vm24_vm1 = vcmask 97280   ;;  %s209_s0 = inlined_call_operand.vmem [shape: f32[32,12], index: 0, kind: input, shape index: {}]   ;;  %s210_s1 = inlined_call_operand.vmem [shape: f32[12,128], index: 1, kind: input, shape index: {}]   ;;  %s211_s2 = inlined_call_operand.vmem [shape: f32[1,128], index: 2, kind: input, shape index: {}]   ;;  %s212_s3 = inlined_call_operand.vmem [shape: f32[1,128], index: 3, kind: input, shape index: {}]   ;;  %s213_s4 = inlined_call_operand.hbm [shape: f32[32,128], index: 4, kind: output, shape index: {}]  }
   0x1   :  { %v23_v0 = vld [vmem:[%s210_s1 + $0x8] sm:$0xf]  ;;  %v22_v1 = vld [vmem:[%s210_s1] sm:$0xff]  ;;  %v20_v2 = vld [vmem:[%s209_s0 + $0x10] sm:$0xff] }
   0x2   :  { %118 = vmatpush.msk.msra.mxu2 %vm37_vm0, %v23_v0  ;;  %119 = vmatpush.msk.msra.mxu3 %vm37_vm0, %v23_v0  ;;  %v21_v3 = vld [vmem:[%s209_s0 + $0x18] sm:$0xff] }
   0x3   :  { %112 = vmatpush.msk.msra.mxu0 %vm37_vm0, %v23_v0  ;;  %117 = vmatpush.msk.msra.mxu1 %vm37_vm0, %v23_v0 }
   0x4   :  { %9 = vsyncpa [#allocation3], 0  ;;  %121 = vmatpush.msra.mxu2 %v22_v1  ;;  %122 = vmatpush.msra.mxu3 %v22_v1  ;;  %v18_v4 = vld [vmem:[%s209_s0] sm:$0xff]  ;;  %v19_v5 = vld [vmem:[%s209_s0 + $0x8] sm:$0xff]  ;;  %s154_s0 = smov [#allocation2]   ;;  %s100_s6 = sshll.u32 %s213_s4, 4  ;;  %s101_s6 = int_to_ptr.hbm [resolvable:$true] %s100_s6 }
   0x5   :  { %115 = vmatmul.msk.f32.vlgmr.msra.gmra.mxu2 %vm24_vm1, %v20_v2  ;;  %116 = vmatmul.msk.f32.vlgmr.msra.gmra.mxu3 %vm24_vm1, %v21_v3  ;;  %v126_v6 = vld [vmem:[%s211_s2] ss:$0 sm:$0xff]  ;;  %s98_s30 = sshll.u32 %s154_s0, 4  ;;  %s156_s7 = smov 8   ;;  %s99_s30 = int_to_ptr.vmem [resolvable:$true] %s98_s30 }
   0x6   :  { %56 = vmatpush.msra.mxu0 %v22_v1  ;;  %120 = vmatpush.msra.mxu1 %v22_v1  ;;  %v127_v7 = vld [vmem:[%s212_s3] ss:$0 sm:$0xff]  ;;  %s155_s3 = smov 128  }
   0x7   :  { %113 = vmatmul.msk.f32.vlgmr.msra.gmra.mxu0 %vm24_vm1, %v18_v4  ;;  %114 = vmatmul.msk.f32.vlgmr.msra.gmra.mxu1 %vm24_vm1, %v19_v5 }
  0x84   :  { %v58_v8 = vpop.f32.mrf.mxu0  ;;  %v61_v9 = vpop.f32.mrf.mxu1 }
  0x85   :  { %v74_v10 = vmul.f32 %v126_v6, %v58_v8  ;;  %v75_v11 = vmul.f32 %v126_v6, %v61_v9 }
  0x87   :  { %v82_v12 = vadd.f32 %v127_v7, %v74_v10  ;;  %v83_v13 = vadd.f32 %v127_v7, %v75_v11 }
  0x88   :  { %v64_v14 = vpop.f32.mrf.mxu2  ;;  %v67_v15 = vpop.f32.mrf.mxu3 }
  0x89   :  { %v86_v16 = vmax.f32 %v82_v12, 0.0  ;;  %v87_v17 = vmax.f32 %v83_v13, 0.0  ;;  %v76_v18 = vmul.f32 %v126_v6, %v64_v14  ;;  %v77_v19 = vmul.f32 %v126_v6, %v67_v15 }
  0x8b   :  { %90 = vst [vmem:[#allocation2] sm:$0xff] %v86_v16  ;;  %v84_v20 = vadd.f32 %v127_v7, %v76_v18  ;;  %v85_v21 = vadd.f32 %v127_v7, %v77_v19 }
  0x8c   :  { %91 = vst [vmem:[#allocation2 + $0x8] sm:$0xff] %v87_v17 }
  0x8d   :  { %v88_v22 = vmax.f32 %v84_v20, 0.0  ;;  %v89_v23 = vmax.f32 %v85_v21, 0.0 }
  0x8f   :  { %92 = vst [vmem:[#allocation2 + $0x10] sm:$0xff] %v88_v22 }
  0x90   :  { %93 = vst [vmem:[#allocation2 + $0x18] sm:$0xff] %v89_v23 }
  0x91   :  { %106 = dma.vmem_to_hbm [thread:$0]  %s99_s30, 512, %s101_s6, [#allocation3], %s155_s3, %s155_s3, %s156_s7  }
  0x92   :  { %152 = dma.done.wait [#allocation3], 512  }
  0x93   :  { %153 = vsyncadd [#allocation3], 4294966784 }
  0x94   :  { %111 = vsyncpa [#allocation3], 1 }

</bundles_post_ra>
